<compile_context>
chip_gen: v7x
topology: tpu7x:2x2x1
jax: 0.10.0
libtpu: 0.0.40
codegen_flags: <defaults>
</compile_context>

<pallas_src>
import jax
import jax.numpy as jnp
from jax import lax
from jax.experimental import pallas as pl
from jax.experimental.pallas import tpu as pltpu


def _round_up(n: int, m: int) -> int:
    return ((n + m - 1) // m) * m


def _make_lsce_kernel(smoothing: float, num_classes: int, tc: int):
    confidence = 1.0 - smoothing
    inv_c = 1.0 / num_classes
    needs_mask = (num_classes % tc) != 0   # only possible on the last class tile

    def kernel(x_ref, xt_ref, out_ref, m_acc, l_acc, s_acc):
        # x_ref  : (TB, TC) logits tile (input dtype)
        # xt_ref : (TB, 1)  f32 target logits (same block for every class step)
        # out_ref: (TB, 1)  f32 per-example loss (written on last class step)
        c = pl.program_id(1)
        last_c = pl.num_programs(1) - 1

        @pl.when(c == 0)
        def _init():
            m_acc[...] = jnp.full_like(m_acc, -jnp.inf)
            l_acc[...] = jnp.zeros_like(l_acc)
            s_acc[...] = jnp.zeros_like(s_acc)

        x = x_ref[...].astype(jnp.float32)                        # (TB, TC)

        def _accumulate(x_for_max, x_for_sum):
            # ---- online logsumexp along the class (lane) axis ----
            m_prev = m_acc[...]
            m_new = jnp.maximum(m_prev,
                                jnp.max(x_for_max, axis=-1, keepdims=True))
            alpha = jnp.exp(m_prev - m_new)                       # 0 on first step
            l_acc[...] = alpha * l_acc[...] + jnp.sum(
                jnp.exp(x_for_max - m_new), axis=-1, keepdims=True)
            m_acc[...] = m_new
            # ---- running sum of logits (for the smoothing mean) ----
            s_acc[...] += jnp.sum(x_for_sum, axis=-1, keepdims=True)

        if needs_mask:
            # Only the last class tile can be partial: pay the mask only there.
            @pl.when(c != last_c)
            def _full_step():
                _accumulate(x, x)

            @pl.when(c == last_c)
            def _masked_step():
                col = lax.broadcasted_iota(jnp.int32, x.shape, 1) + c * tc
                valid = col < num_classes
                _accumulate(jnp.where(valid, x, -jnp.inf),
                            jnp.where(valid, x, 0.0))
        else:
            _accumulate(x, x)

        @pl.when(c == last_c)
        def _finalize():
            lse = m_acc[...] + jnp.log(l_acc[...])                # (TB, 1)
            out_ref[...] = (lse
                            - confidence * xt_ref[...]
                            - smoothing * (s_acc[...] * inv_c))

    return kernel


def _tpu_tile_config():
    """Generation-aware (logits tile byte budget, vmem_limit_bytes)."""
    try:
        vmem_cap = int(pltpu.get_tpu_info().vmem_capacity_bytes)
    except Exception:
        vmem_cap = 64 * 1024 * 1024          # conservative (v7x-sized) fallback
    if vmem_cap >= 100 * 1024 * 1024:        # v5e / v6e: 128 MiB physical VMEM
        return 16 * 1024 * 1024, 64 * 1024 * 1024
    # v7x: 64 MiB VMEM per TensorCore -> keep the 2x double buffer small.
    return 8 * 1024 * 1024, 40 * 1024 * 1024


def label_smoothing_cross_entropy(x: jax.Array, target: jax.Array,
                                  smoothing: float = 0.1,
                                  block_b: int = 256,
                                  block_c: int | None = None) -> jax.Array:
    """Per-example label-smoothed NLL loss. x: [B, C] float, target: [B] int."""
    assert smoothing < 1.0
    B, C = x.shape
    itemsize = jnp.dtype(x.dtype).itemsize
    # sublane alignment depends on element width (f32: 8, bf16: 16, int8/fp8: 32)
    row_align = {4: 8, 2: 16, 1: 32}.get(itemsize, 8)

    tile_budget, vmem_limit = _tpu_tile_config()

    # Batch tiling: aim for >=2 batch tiles whenever alignment allows so both
    # v7x TensorCores get work; the extra grid step is ~free on v5e/v6e.
    if B <= block_b:
        tb = min(_round_up(B, row_align),
                 _round_up(max(-(-B // 2), 1), row_align))
    else:
        tb = _round_up(block_b, row_align)
    b_pad = _round_up(B, tb)

    # Class tiling: constant-byte DMA step (scales inversely with itemsize).
    if block_c is None:
        tc_budget = max((tile_budget // (tb * itemsize)) // 128 * 128, 128)
    else:
        tc_budget = _round_up(block_c, 128)
    tc = C if C <= tc_budget else tc_budget   # full class axis if it fits

    grid = (b_pad // tb, pl.cdiv(C, tc))      # batch tiles, then class tiles

    # Pad the batch axis so every batch tile is full; padded rows are finite
    # (zeros, target 0) and sliced away at the end.
    if b_pad != B:
        x = jnp.pad(x, ((0, b_pad - B), (0, 0)))
        target = jnp.pad(target, (0, b_pad - B))

    # Target-logit gather hoisted out of the kernel: touches only B elements.
    tgt = target.astype(jnp.int32)
    x_t = jnp.take_along_axis(x, tgt[:, None], axis=-1).astype(jnp.float32)

    cost = pl.CostEstimate(
        flops=4 * b_pad * C,
        transcendentals=b_pad * C,
        bytes_accessed=b_pad * C * itemsize + 2 * b_pad * 4,
    )

    out = pl.pallas_call(
        _make_lsce_kernel(float(smoothing), C, tc),
        out_shape=jax.ShapeDtypeStruct((b_pad, 1), jnp.float32),
        grid_spec=pltpu.PrefetchScalarGridSpec(
            num_scalar_prefetch=0,
            grid=grid,
            in_specs=[
                pl.BlockSpec((tb, tc), lambda i, c: (i, c)),   # logits tile
                pl.BlockSpec((tb, 1), lambda i, c: (i, 0)),    # target logit (resident)
            ],
            out_specs=pl.BlockSpec((tb, 1), lambda i, c: (i, 0)),  # accumulator output
            scratch_shapes=[
                pltpu.VMEM((tb, 1), jnp.float32),   # running max
                pltpu.VMEM((tb, 1), jnp.float32),   # running sum exp
                pltpu.VMEM((tb, 1), jnp.float32),   # running sum of logits
            ],
        ),
        compiler_params=pltpu.CompilerParams(
            dimension_semantics=("parallel", "arbitrary"),
            vmem_limit_bytes=vmem_limit,
        ),
        cost_estimate=cost,
    )(x, x_t)
    return out[:B, 0]


def _reference(x, target, smoothing=0.1):
    # pure-JAX reference mirroring the PyTorch forward
    logprobs = jax.nn.log_softmax(x.astype(jnp.float32), axis=-1)
    nll = -jnp.take_along_axis(logprobs, target[:, None], axis=-1)[:, 0]
    smooth = -jnp.mean(logprobs, axis=-1)
    return (1.0 - smoothing) * nll + smoothing * smooth


if __name__ == "__main__":
    key = jax.random.PRNGKey(0)
    kx1, kt1, kx2, kt2 = jax.random.split(key, 4)

    # Test 1: f32, shapes chosen to exercise batch padding, a partial (masked)
    # last class tile, and multi-step online-softmax accumulation (grid = (2, 2)).
    B1, C1 = 10, 200
    x1 = jax.random.normal(kx1, (B1, C1), dtype=jnp.float32) * 3.0
    t1 = jax.random.randint(kt1, (B1,), 0, C1, dtype=jnp.int32)
    out1 = label_smoothing_cross_entropy(x1, t1, smoothing=0.1,
                                         block_b=8, block_c=128)
    out1 = jax.block_until_ready(out1)
    ref1 = _reference(x1, t1, smoothing=0.1)
    assert out1.shape == (B1,)
    assert jnp.allclose(out1, ref1, atol=1e-4, rtol=1e-4), (out1, ref1)

    # Test 2: bf16 logits read natively, auto (generation-aware) tiling.
    B2, C2 = 16, 256
    x2 = jax.random.normal(kx2, (B2, C2), dtype=jnp.float32).astype(jnp.bfloat16)
    t2 = jax.random.randint(kt2, (B2,), 0, C2, dtype=jnp.int32)
    out2 = label_smoothing_cross_entropy(x2, t2, smoothing=0.1)
    out2 = jax.block_until_ready(out2)
    ref2 = _reference(x2.astype(jnp.float32), t2, smoothing=0.1)
    assert out2.shape == (B2,)
    assert jnp.allclose(out2, ref2, atol=1e-3, rtol=1e-3), (out2, ref2)

    print("KERNEL_OK")
</pallas_src>

<mosaic_0001>
module attributes {stable_mosaic.version = 11 : i64} {
  func.func @kernel(%arg0: i32, %arg1: i32, %arg2: memref<8x128xf32, #tpu.memory_space<vmem>>, %arg3: memref<8x1xf32, #tpu.memory_space<vmem>>, %arg4: memref<8x1xf32, #tpu.memory_space<vmem>>, %arg5: memref<8x1xf32, #tpu.memory_space<vmem>>, %arg6: memref<8x1xf32, #tpu.memory_space<vmem>>, %arg7: memref<8x1xf32, #tpu.memory_space<vmem>>) attributes {dimension_semantics = [#tpu.dimension_semantics<parallel>, #tpu.dimension_semantics<arbitrary>], iteration_bounds = array<i64: 2, 2>, scalar_prefetch = 0 : i64, scratch_operands = 3 : i64, tpu.core_type = #tpu.core_type<tc>, window_params = [{transform_indices = @transform_0, window_bounds = array<i64: 8, 128>}, {transform_indices = @transform_1, window_bounds = array<i64: 8, 1>}, {transform_indices = @transform_2, window_bounds = array<i64: 8, 1>}]} {
    %c0_i32 = arith.constant 0 : i32
    %0 = arith.cmpi eq, %arg1, %c0_i32 : i32
    %1 = arith.extui %0 : i1 to i32
    %c0_i32_0 = arith.constant 0 : i32
    %2 = arith.cmpi ne, %1, %c0_i32_0 : i32
    scf.if %2 {
      %cst = arith.constant 0xFF800000 : f32
      %13 = vector.broadcast %cst : f32 to vector<8x1xf32>
      %c0_7 = arith.constant 0 : index
      %c0_8 = arith.constant 0 : index
      %14 = vector.load %arg5[%c0_7, %c0_8] : memref<8x1xf32, #tpu.memory_space<vmem>>, vector<8x1xf32>
      tpu.vector_store %arg5[%c0_7, %c0_8], %13 {strides = array<i32>} : memref<8x1xf32, #tpu.memory_space<vmem>>, vector<8x1xf32>,
      %cst_9 = arith.constant 0.000000e+00 : f32
      %15 = vector.broadcast %cst_9 : f32 to vector<8x1xf32>
      %c0_10 = arith.constant 0 : index
      %c0_11 = arith.constant 0 : index
      %16 = vector.load %arg6[%c0_10, %c0_11] : memref<8x1xf32, #tpu.memory_space<vmem>>, vector<8x1xf32>
      tpu.vector_store %arg6[%c0_10, %c0_11], %15 {strides = array<i32>} : memref<8x1xf32, #tpu.memory_space<vmem>>, vector<8x1xf32>,
      %cst_12 = arith.constant 0.000000e+00 : f32
      %17 = vector.broadcast %cst_12 : f32 to vector<8x1xf32>
      %c0_13 = arith.constant 0 : index
      %c0_14 = arith.constant 0 : index
      %18 = vector.load %arg7[%c0_13, %c0_14] : memref<8x1xf32, #tpu.memory_space<vmem>>, vector<8x1xf32>
      tpu.vector_store %arg7[%c0_13, %c0_14], %17 {strides = array<i32>} : memref<8x1xf32, #tpu.memory_space<vmem>>, vector<8x1xf32>,
    } else {
    }
    %c0 = arith.constant 0 : index
    %c0_1 = arith.constant 0 : index
    %3 = vector.load %arg2[%c0, %c0_1] : memref<8x128xf32, #tpu.memory_space<vmem>>, vector<8x128xf32>
    %c1_i32 = arith.constant 1 : i32
    %4 = arith.cmpi ne, %arg1, %c1_i32 : i32
    %5 = arith.extui %4 : i1 to i32
    %c0_i32_2 = arith.constant 0 : i32
    %6 = arith.cmpi ne, %5, %c0_i32_2 : i32
    scf.if %6 {
      %c0_7 = arith.constant 0 : index
      %c0_8 = arith.constant 0 : index
      %13 = vector.load %arg5[%c0_7, %c0_8] : memref<8x1xf32, #tpu.memory_space<vmem>>, vector<8x1xf32>
      %cst = arith.constant dense<0xFF800000> : vector<8xf32>
      %14 = vector.multi_reduction <maximumf>, %3, %cst [1] : vector<8x128xf32> to vector<8xf32>
      %15 = vector.shape_cast %14 : vector<8xf32> to vector<8x1xf32>
      %16 = arith.maximumf %13, %15 : vector<8x1xf32>
      %17 = arith.subf %13, %16 : vector<8x1xf32>
      %18 = math.exp %17 : vector<8x1xf32>
      %c0_9 = arith.constant 0 : index
      %c0_10 = arith.constant 0 : index
      %19 = vector.load %arg6[%c0_9, %c0_10] : memref<8x1xf32, #tpu.memory_space<vmem>>, vector<8x1xf32>
      %20 = arith.mulf %18, %19 : vector<8x1xf32>
      %21 = vector.broadcast %16 : vector<8x1xf32> to vector<8x128xf32>
      %22 = arith.subf %3, %21 : vector<8x128xf32>
      %23 = math.exp %22 : vector<8x128xf32>
      %cst_11 = arith.constant dense<0.000000e+00> : vector<8xf32>
      %24 = vector.multi_reduction <add>, %23, %cst_11 [1] : vector<8x128xf32> to vector<8xf32>
      %25 = vector.shape_cast %24 : vector<8xf32> to vector<8x1xf32>
      %26 = arith.addf %20, %25 : vector<8x1xf32>
      %c0_12 = arith.constant 0 : index
      %c0_13 = arith.constant 0 : index
      %27 = vector.load %arg6[%c0_12, %c0_13] : memref<8x1xf32, #tpu.memory_space<vmem>>, vector<8x1xf32>
      tpu.vector_store %arg6[%c0_12, %c0_13], %26 {strides = array<i32>} : memref<8x1xf32, #tpu.memory_space<vmem>>, vector<8x1xf32>,
      %c0_14 = arith.constant 0 : index
      %c0_15 = arith.constant 0 : index
      %28 = vector.load %arg5[%c0_14, %c0_15] : memref<8x1xf32, #tpu.memory_space<vmem>>, vector<8x1xf32>
      tpu.vector_store %arg5[%c0_14, %c0_15], %16 {strides = array<i32>} : memref<8x1xf32, #tpu.memory_space<vmem>>, vector<8x1xf32>,
      %c0_16 = arith.constant 0 : index
      %c0_17 = arith.constant 0 : index
      %29 = vector.load %arg7[%c0_16, %c0_17] : memref<8x1xf32, #tpu.memory_space<vmem>>, vector<8x1xf32>
      %cst_18 = arith.constant dense<0.000000e+00> : vector<8xf32>
      %30 = vector.multi_reduction <add>, %3, %cst_18 [1] : vector<8x128xf32> to vector<8xf32>
      %31 = vector.shape_cast %30 : vector<8xf32> to vector<8x1xf32>
      %32 = arith.addf %29, %31 : vector<8x1xf32>
      %c0_19 = arith.constant 0 : index
      %c0_20 = arith.constant 0 : index
      %33 = vector.load %arg7[%c0_19, %c0_20] : memref<8x1xf32, #tpu.memory_space<vmem>>, vector<8x1xf32>
      tpu.vector_store %arg7[%c0_19, %c0_20], %32 {strides = array<i32>} : memref<8x1xf32, #tpu.memory_space<vmem>>, vector<8x1xf32>,
    } else {
    }
    %c1_i32_3 = arith.constant 1 : i32
    %7 = arith.cmpi eq, %arg1, %c1_i32_3 : i32
    %8 = arith.extui %7 : i1 to i32
    %c0_i32_4 = arith.constant 0 : i32
    %9 = arith.cmpi ne, %8, %c0_i32_4 : i32
    scf.if %9 {
      %13 = tpu.iota {dimensions = array<i32: 1>} : vector<8x128xi32>
      %c128_i32 = arith.constant 128 : i32
      %14 = arith.muli %arg1, %c128_i32 : i32
      %15 = vector.broadcast %14 : i32 to vector<8x128xi32>
      %16 = arith.addi %13, %15 : vector<8x128xi32>
      %c200_i32 = arith.constant 200 : i32
      %17 = vector.broadcast %c200_i32 : i32 to vector<8x128xi32>
      %18 = arith.cmpi slt, %16, %17 : vector<8x128xi32>
      %cst = arith.constant 0xFF800000 : f32
      %19 = vector.broadcast %cst : f32 to vector<8x128xf32>
      %20 = arith.select %18, %3, %19 : vector<8x128xi1>, vector<8x128xf32>
      %cst_7 = arith.constant 0.000000e+00 : f32
      %21 = vector.broadcast %cst_7 : f32 to vector<8x128xf32>
      %22 = arith.select %18, %3, %21 : vector<8x128xi1>, vector<8x128xf32>
      %c0_8 = arith.constant 0 : index
      %c0_9 = arith.constant 0 : index
      %23 = vector.load %arg5[%c0_8, %c0_9] : memref<8x1xf32, #tpu.memory_space<vmem>>, vector<8x1xf32>
      %cst_10 = arith.constant dense<0xFF800000> : vector<8xf32>
      %24 = vector.multi_reduction <maximumf>, %20, %cst_10 [1] : vector<8x128xf32> to vector<8xf32>
      %25 = vector.shape_cast %24 : vector<8xf32> to vector<8x1xf32>
      %26 = arith.maximumf %23, %25 : vector<8x1xf32>
      %27 = arith.subf %23, %26 : vector<8x1xf32>
      %28 = math.exp %27 : vector<8x1xf32>
      %c0_11 = arith.constant 0 : index
      %c0_12 = arith.constant 0 : index
      %29 = vector.load %arg6[%c0_11, %c0_12] : memref<8x1xf32, #tpu.memory_space<vmem>>, vector<8x1xf32>
      %30 = arith.mulf %28, %29 : vector<8x1xf32>
      %31 = vector.broadcast %26 : vector<8x1xf32> to vector<8x128xf32>
      %32 = arith.subf %20, %31 : vector<8x128xf32>
      %33 = math.exp %32 : vector<8x128xf32>
      %cst_13 = arith.constant dense<0.000000e+00> : vector<8xf32>
      %34 = vector.multi_reduction <add>, %33, %cst_13 [1] : vector<8x128xf32> to vector<8xf32>
      %35 = vector.shape_cast %34 : vector<8xf32> to vector<8x1xf32>
      %36 = arith.addf %30, %35 : vector<8x1xf32>
      %c0_14 = arith.constant 0 : index
      %c0_15 = arith.constant 0 : index
      %37 = vector.load %arg6[%c0_14, %c0_15] : memref<8x1xf32, #tpu.memory_space<vmem>>, vector<8x1xf32>
      tpu.vector_store %arg6[%c0_14, %c0_15], %36 {strides = array<i32>} : memref<8x1xf32, #tpu.memory_space<vmem>>, vector<8x1xf32>,
      %c0_16 = arith.constant 0 : index
      %c0_17 = arith.constant 0 : index
      %38 = vector.load %arg5[%c0_16, %c0_17] : memref<8x1xf32, #tpu.memory_space<vmem>>, vector<8x1xf32>
      tpu.vector_store %arg5[%c0_16, %c0_17], %26 {strides = array<i32>} : memref<8x1xf32, #tpu.memory_space<vmem>>, vector<8x1xf32>,
      %c0_18 = arith.constant 0 : index
      %c0_19 = arith.constant 0 : index
      %39 = vector.load %arg7[%c0_18, %c0_19] : memref<8x1xf32, #tpu.memory_space<vmem>>, vector<8x1xf32>
      %cst_20 = arith.constant dense<0.000000e+00> : vector<8xf32>
      %40 = vector.multi_reduction <add>, %22, %cst_20 [1] : vector<8x128xf32> to vector<8xf32>
      %41 = vector.shape_cast %40 : vector<8xf32> to vector<8x1xf32>
      %42 = arith.addf %39, %41 : vector<8x1xf32>
      %c0_21 = arith.constant 0 : index
      %c0_22 = arith.constant 0 : index
      %43 = vector.load %arg7[%c0_21, %c0_22] : memref<8x1xf32, #tpu.memory_space<vmem>>, vector<8x1xf32>
      tpu.vector_store %arg7[%c0_21, %c0_22], %42 {strides = array<i32>} : memref<8x1xf32, #tpu.memory_space<vmem>>, vector<8x1xf32>,
    } else {
    }
    %c1_i32_5 = arith.constant 1 : i32
    %10 = arith.cmpi eq, %arg1, %c1_i32_5 : i32
    %11 = arith.extui %10 : i1 to i32
    %c0_i32_6 = arith.constant 0 : i32
    %12 = arith.cmpi ne, %11, %c0_i32_6 : i32
    scf.if %12 {
      %c0_7 = arith.constant 0 : index
      %c0_8 = arith.constant 0 : index
      %13 = vector.load %arg5[%c0_7, %c0_8] : memref<8x1xf32, #tpu.memory_space<vmem>>, vector<8x1xf32>
      %c0_9 = arith.constant 0 : index
      %c0_10 = arith.constant 0 : index
      %14 = vector.load %arg6[%c0_9, %c0_10] : memref<8x1xf32, #tpu.memory_space<vmem>>, vector<8x1xf32>
      %15 = math.log %14 : vector<8x1xf32>
      %16 = arith.addf %13, %15 : vector<8x1xf32>
      %c0_11 = arith.constant 0 : index
      %c0_12 = arith.constant 0 : index
      %17 = vector.load %arg3[%c0_11, %c0_12] : memref<8x1xf32, #tpu.memory_space<vmem>>, vector<8x1xf32>
      %cst = arith.constant 0.899999976 : f32
      %18 = vector.broadcast %cst : f32 to vector<8x1xf32>
      %19 = arith.mulf %18, %17 : vector<8x1xf32>
      %20 = arith.subf %16, %19 : vector<8x1xf32>
      %c0_13 = arith.constant 0 : index
      %c0_14 = arith.constant 0 : index
      %21 = vector.load %arg7[%c0_13, %c0_14] : memref<8x1xf32, #tpu.memory_space<vmem>>, vector<8x1xf32>
      %cst_15 = arith.constant 5.000000e-03 : f32
      %22 = vector.broadcast %cst_15 : f32 to vector<8x1xf32>
      %23 = arith.mulf %21, %22 : vector<8x1xf32>
      %cst_16 = arith.constant 1.000000e-01 : f32
      %24 = vector.broadcast %cst_16 : f32 to vector<8x1xf32>
      %25 = arith.mulf %24, %23 : vector<8x1xf32>
      %26 = arith.subf %20, %25 : vector<8x1xf32>
      %c0_17 = arith.constant 0 : index
      %c0_18 = arith.constant 0 : index
      %27 = vector.load %arg4[%c0_17, %c0_18] : memref<8x1xf32, #tpu.memory_space<vmem>>, vector<8x1xf32>
      tpu.vector_store %arg4[%c0_17, %c0_18], %26 {strides = array<i32>} : memref<8x1xf32, #tpu.memory_space<vmem>>, vector<8x1xf32>,
    } else {
    }
    return
  }
  func.func @transform_0(%arg0: i32, %arg1: i32) -> (i32, i32) {
    %c0_i32 = arith.constant 0 : i32
    return %arg0, %arg1 : i32, i32
  }
  func.func @transform_1(%arg0: i32, %arg1: i32) -> (i32, i32) {
    %c0_i32 = arith.constant 0 : i32
    %c0_i32_0 = arith.constant 0 : i32
    return %arg0, %c0_i32 : i32, i32
  }
  func.func @transform_2(%arg0: i32, %arg1: i32) -> (i32, i32) {
    %c0_i32 = arith.constant 0 : i32
    %c0_i32_0 = arith.constant 0 : i32
    return %arg0, %c0_i32 : i32, i32
  }
}

</mosaic_0001>

<bundles_post_ra>
// kernel: tpu_custom_call.1
= control target key start
LH: loop header
LB: loop body
LE: loop exit
PB: predicated region body
PF: predicated region fallthrough
CT: control target
= control target key end

     0   :  { %7 = vsyncpa [#allocation6], 0  ;;  %s770_s0 = inlined_call_operand.hbm [shape: f32[16,200], index: 0, kind: input, shape index: {}]   ;;  %s771_s1 = inlined_call_operand.vmem [shape: f32[16,1], index: 1, kind: input, shape index: {}]   ;;  %s772_s2 = inlined_call_operand.vmem [shape: f32[16,1], index: 2, kind: output, shape index: {}]  }
   0x1   :  { %9 = vsyncpa [#allocation6 + $0x1], 0  ;;  %s598_s9 = smov 0   ;;  %s600_s10 = smov 0  }
   0x2   :  { %s602_s11 = smov 0   ;;  %s604_s12 = smov 0  }
   0x3   :  { %s606_s13 = smov 0   ;;  %s608_s14 = smov 0  }
   0x4   :  { %s610_s15 = smov 0   ;;  %s612_s16 = smov 0  }
   0x5 LB: > { %s376_s17 = sadd.s32 4294967295, %s576_s16   ;;  %s24_s18 = sadd.s32 1, %s568_s14  ;;  %s576_s16 = sphi %s612_s16, %s15_s16   ;;  %s572_s15 = sphi %s610_s15, %s784_s15   ;;  %s568_s14 = sphi %s608_s14, %s783_s14   ;;  %s564_s13 = sphi %s606_s13, %s782_s13   ;;  %s560_s12 = sphi %s604_s12, %s781_s12   ;;  %s556_s11 = sphi %s602_s11, %s780_s11   ;;  %s552_s10 = sphi %s600_s10, %s779_s10   ;;  %s548_s9 = sphi %s598_s9, %s778_s9  }
   0x6   : > { %p25_p0 = scmp.ge.s32.totalorder %s24_s18, 2  ;;  %s27_s19 = sadd.s32 1, %s572_s15 }
   0x7   : > { %s36_s20 = sadd.s32 1, %s556_s11  ;;  %p43_p1 = scmp.ne.s32.totalorder %s556_s11, %s552_s10 }
   0x8   : > { %s786_s18 = smov (%p25_p0, %s24_s18), 0  ;;  %s788_s19 = smov (!%p25_p0, %s27_s19), %s572_s15 }
   0x9   : > { %s32_s21 = ssub.s32 %s568_s14, %s786_s18  ;;  %p44_p2 = scmp.eq.s32.totalorder %s576_s16, 0 }
   0xa   : > { %p29_p3 = scmp.ge.s32.totalorder %s788_s19, 2  ;;  %p49_p4 = scmp.ne.s32.totalorder %s552_s10, %s548_s9 }
   0xb   : > { %p649_p5 = por %p44_p2, %p43_p1  ;;  %p50_p6 = scmp.eq.s32.totalorder %s376_s17, 0 }
   0xc   : > { %s790_s19 = smov (%p29_p3, %s788_s19), 0  ;;  %p399_p8 = scmp.lt.s32.totalorder %s576_s16, 4 }
   0xd   : > { %p655_p7 = por %p50_p6, %p49_p4  ;;  %s31_s24 = ssub.s32 %s572_s15, %s790_s19 }
   0xe   : > { %s33_s25 = sor.u32 %s32_s21, %s31_s24  ;;  %s125_s26 = sand.u32 1, %s556_s11  }
   0xf   : > { %p34_p9 = scmp.eq.s32.totalorder %s33_s25, 0  ;;  %s380_s27 = sshll.u32 %s125_s26, 3 }
  0x10   : > { %s381_s28 = sshll.u32 %s572_s15, 1  ;;  %s129_s4 = scalar_lea.vmem [#allocation5], %s380_s27 }
  0x11   : > { %s665_s29 = scalar_select %p34_p9, %s556_s11, %s36_s20  }
  0x12   : > { %s134_s30 = sadd.s32 %s568_s14, %s381_s28  ;;  %s138_s5 = sshll.u32 %s129_s4, 4  ;;  %s673_s5 = int_to_ptr.vmem [resolvable:$true] %s138_s5 }
  0x13   : > { %s382_s3 = sshll.u32 %s134_s30, 7  ;;  %p679_p10 = pnand %p399_p8, %p649_p5 }
  0x14   : > { %s671_s8 = scalar_lea.hbm %s770_s0, %s382_s3  ;;  %s126_s17 = scalar_lea.sflag [#allocation6], %s125_s26 }
  0x15   : > { %s480_s20 = scalar_lea.hbm %s671_s8, 128  ;;  %p482_p0 = pneg %p679_p10 }
  0x16   : > { %p481_p13 = scmp.ne.s32.totalorder %s671_s8, %s480_s20  ;;  %s485_s24 = scalar_lea.hbm %s770_s0, 512 }
  0x17   : > { %p486_p3 = scmp.lt.u32.totalorder %s671_s8, %s770_s0  ;;  %p487_p4 = scmp.lt.u32.totalorder %s485_s24, %s480_s20 }
  0x18   : > { %p483_p1 = pnand %p482_p0, %p481_p13  ;;  %p489_p6 = scmp.lt.u32.totalorder %s480_s20, %s671_s8 }
  0x19   : > { %p488_p5 = por %p487_p4, %p486_p3 }
  0x1a   : > { %p484_p2 = pneg %p483_p1 }
  0x1b   : > { %p490_p8 = por %p489_p6, %p488_p5 }
  0x1d   : > { %p491_p9 = pnand %p490_p8, %p484_p2 }
  0x1f   : > { %494 = shalt.err (!%p491_p9)
}
  0x20   : > { %s495_s26 = scalar_lea.vmem %s673_s5, 128  ;;  %s578_s28 = smov [#allocation5]  }
  0x21   : > { %p496_p13 = scmp.ne.s32.totalorder %s673_s5, %s495_s26  ;;  %s500_s30 = sshll.u32 %s578_s28, 4  ;;  %s501_s30 = int_to_ptr.vmem [resolvable:$false] %s500_s30 }
  0x22   : > { %s502_s3 = scalar_lea.vmem %s501_s30, 256  ;;  %p503_p12 = scmp.lt.s32.totalorder %s673_s5, %s501_s30 }
  0x23   : > { %p498_p1 = pnand %p496_p13, %p482_p0  ;;  %p504_p3 = scmp.lt.s32.totalorder %s502_s3, %s495_s26 }
  0x25   : > { %p499_p11 = pneg %p498_p1  ;;  %p505_p4 = por %p504_p3, %p503_p12 }
  0x27   : > { %p506_p5 = pnand %p505_p4, %p499_p11 }
  0x29   : > { %509 = shalt.err (!%p506_p5)
}
  0x2a   : > { %398 = dma.hbm_to_vmem [thread:$0]  (!%p679_p10), %s671_s8, 128, %s673_s5, %s126_s17  }
  0x2b   : > { %p776_p2 = scmp.lt.s32.totalorder %s576_s16, 5  ;;  %p777_p6 = scmp.ge.s32.totalorder %s576_s16, 1 }
  0x2d   : > { %p151_p0 = pnand %p777_p6, %p776_p2 }
  0x2e   : > { %s156_s4 = sand.u32 (!%p151_p0), 1, %s552_s10  }
  0x2f   : > { %154 = sbr.rel (%p151_p0) target bundleno = 969 (0x3c9), region = 28  ;;  %s384_s6 = sshll.u32 (!%p151_p0), %s156_s4, 3 }
  0x30   : > { %s157_s7 = scalar_lea.sflag (!%p151_p0), [#allocation6], %s156_s4  ;;  %s160_s20 = scalar_lea.vmem (!%p151_p0), [#allocation5], %s384_s6 }
  0x36   : > { %543 = dma.done.wait (%p655_p7), %s157_s7, 128  }
  0x37   : > { %545 = vsyncadd (%p655_p7), %s157_s7, 4294967168  ;;  %p184_p11 = scmp.lt.s32.totalorder %s564_s13, 1  ;;  %p387_p10 = scmp.ne.s32.totalorder %s560_s12, 0 }
  0x38   : > { %vm196_vm0 = vcmask (!%p387_p10), 7168   ;;  %v579_v0 = vmov (!%p387_p10), -inf   ;;  %v580_v1 = vmov (!%p387_p10), 0.0  }
  0x39   : > { %s792_s13 = smov (!%p184_p11, %s564_s13), 1  ;;  %195 = sbr.rel (%p387_p10) target bundleno = 64 (0x40), region = 36 }
  0x3a   : > { %s385_s5 = sshll.u32 %s792_s13, 3  ;;  %197 = vst.msk [vmem:[#allocation2] sm:$0xff] (!%p387_p10), %vm196_vm0, %v579_v0  ;;  %198 = vst.msk [vmem:[#allocation3] sm:$0xff] (!%p387_p10), %vm196_vm0, %v580_v1 }
  0x3b   : > { %s724_s17 = scalar_lea.vmem %s771_s1, %s385_s5  ;;  %s729_s24 = scalar_lea.vmem %s772_s2, %s385_s5  ;;  %199 = vst.msk [vmem:[#allocation4] sm:$0xff] (!%p387_p10), %vm196_vm0, %v580_v1 }
  0x40 PF: > { %v200_v2 = vld [vmem:[%s160_s20] sm:$0xff]  ;;  %p388_p7 = scmp.eq.s32.totalorder %s560_s12, 1 }
  0x41   : > { %206 = vmax.xlane.f32.xlu0 (!%p388_p7), %v200_v2  ;;  %v581_v3 = vmov (!%p388_p7), 0   ;;  %v205_v4 = vld [vmem:[#allocation2] sm:$0xff] (!%p388_p7)  ;;  %vm225_vm1 = vcmask (!%p388_p7), 7168   ;;  %v212_v14 = vld [vmem:[#allocation3] sm:$0xff] (!%p388_p7) }
  0x42   : > { %204 = sbr.rel (%p388_p7) target bundleno = 501 (0x1f5), region = 40  ;;  %468 = vset.pattern.permute.xlu0 (!%p388_p7), %v581_v3  ;;  %v228_v18 = vld [vmem:[#allocation4] sm:$0xff] (!%p388_p7) }
  0xce   : > { %v207_v5 = vpop.xlane.xlu0 %206 }
  0xcf   : > { %v208_v6 = vmax.f32 %v205_v4, %v207_v5 }
  0xd1   : > { %v209_v7 = vsub.f32 %v205_v4, %v208_v6  ;;  %227 = vst.msk [vmem:[#allocation2] sm:$0xff] %vm225_vm1, %v208_v6  ;;  %216 = vperm.xlu0 %468, %v208_v6  }
  0xd3   : > { %v210_v12 = vmul.f32 1.442695, %v209_v7 }
 0x150   : > { %v217_v8 = vpop.permute.xlu0 %216 }
 0x151   : > { %v219_v9 = vsub.f32 %v200_v2, %v217_v8 }
 0x153   : > { %v220_v10 = vmul.f32 1.442695, %v219_v9 }
 0x155   : > { %469 = vpow2.f32 %v220_v10 }
 0x156   : > { %471 = vpow2.f32 %v210_v12 }
 0x15f   : > { %v470_v11 = vpop.eup %469 }
 0x160   : > { %222 = vadd.xlane.f32.xlu1 %v470_v11  ;;  %v472_v13 = vpop.eup %471 }
 0x161   : > { %v213_v15 = vmul.f32 %v472_v13, %v212_v14 }
 0x164   : > { %229 = vadd.xlane.f32.xlu1 %v200_v2 }
 0x1ed   : > { %v223_v16 = vpop.xlane.xlu1 %222 }
 0x1ee   : > { %v224_v17 = vadd.f32 %v223_v16, %v213_v15 }
 0x1f0   : > { %226 = vst.msk [vmem:[#allocation3] sm:$0xff] %vm225_vm1, %v224_v17 }
 0x1f1   : > { %v230_v19 = vpop.xlane.xlu1 %229 }
 0x1f2   : > { %v231_v20 = vadd.f32 %v230_v19, %v228_v18 }
 0x1f4   : > { %232 = vst.msk [vmem:[#allocation4] sm:$0xff] %vm225_vm1, %v231_v20 }
 0x1f5 PF: > { %p389_p12 = scmp.ne.s32.totalorder %s560_s12, 1 }
 0x1f6   : > { %v237_v21 = vlaneseq (!%p389_p12)  ;;  %s390_s13 = sshll.u32 (!%p389_p12), %s560_s12, 7  ;;  %v582_v26 = vmov (!%p389_p12), 0   ;;  %v245_v27 = vld [vmem:[#allocation2] sm:$0xff] (!%p389_p12)  ;;  %vm265_vm3 = vcmask (!%p389_p12), 7168  }
 0x1f7   : > { %236 = sbr.rel (%p389_p12) target bundleno = 969 (0x3c9), region = 44  ;;  %v240_v22 = vstv (!%p389_p12), %s390_s13  ;;  %473 = vset.pattern.permute.xlu0 (!%p389_p12), %v582_v26  ;;  %v252_v38 = vld [vmem:[#allocation3] sm:$0xff] (!%p389_p12)  ;;  %v278_v47 = vld [vmem:[%s724_s17] sm:$0xff] (!%p389_p12) }
 0x1f8   : > { %v238_v23 = vand.u32 (!%p389_p12), 127, %v237_v21  ;;  %v279_v51 = vmul.f32 (!%p389_p12), 0.9, %v278_v47 }
 0x1fa   : > { %v241_v24 = vadd.s32 (!%p389_p12), %v240_v22, %v238_v23 }
 0x1fb   : > { %v268_v42 = vld [vmem:[#allocation4] sm:$0xff] (!%p389_p12) }
 0x1fc   : > { %vm242_vm2 = vcmp.lt.s32.totalorder (!%p389_p12), %v241_v24, 200 }
 0x1fd   : > { %v243_v25 = vsel (!%p389_p12), %vm242_vm2, %v200_v2, -inf  ;;  %v244_v35 = vsel (!%p389_p12), %vm242_vm2, %v200_v2, 0.0 }
 0x1fe   : > { %246 = vmax.xlane.f32.xlu0 %v243_v25 }
 0x28b   : > { %v247_v28 = vpop.xlane.xlu0 %246 }
 0x28c   : > { %v248_v29 = vmax.f32 %v245_v27, %v247_v28 }
 0x28e   : > { %v249_v30 = vsub.f32 %v245_v27, %v248_v29  ;;  %267 = vst.msk [vmem:[#allocation2] sm:$0xff] %vm265_vm3, %v248_v29  ;;  %256 = vperm.xlu0 %473, %v248_v29  }
 0x290   : > { %v250_v36 = vmul.f32 1.442695, %v249_v30 }
 0x295   : > { %v273_v52 = vld [vmem:[#allocation2] sm:$0xff] }
 0x30d   : > { %v257_v31 = vpop.permute.xlu0 %256 }
 0x30e   : > { %v259_v32 = vsub.f32 %v243_v25, %v257_v31 }
 0x310   : > { %v260_v33 = vmul.f32 1.442695, %v259_v32 }
 0x312   : > { %474 = vpow2.f32 %v260_v33 }
 0x313   : > { %476 = vpow2.f32 %v250_v36 }
 0x31c   : > { %v475_v34 = vpop.eup %474 }
 0x31d   : > { %262 = vadd.xlane.f32.xlu1 %v475_v34  ;;  %v477_v37 = vpop.eup %476 }
 0x31e   : > { %v253_v39 = vmul.f32 %v477_v37, %v252_v38 }
 0x321   : > { %269 = vadd.xlane.f32.xlu1 %v244_v35 }
 0x3aa   : > { %v263_v40 = vpop.xlane.xlu1 %262 }
 0x3ab   : > { %v264_v41 = vadd.f32 %v263_v40, %v253_v39 }
 0x3ad   : > { %266 = vst.msk [vmem:[#allocation3] sm:$0xff] %vm265_vm3, %v264_v41 }
 0x3ae   : > { %v270_v43 = vpop.xlane.xlu1 %269 }
 0x3af   : > { %v271_v44 = vadd.f32 %v270_v43, %v268_v42 }
 0x3b1   : > { %272 = vst.msk [vmem:[#allocation4] sm:$0xff] %vm265_vm3, %v271_v44 }
 0x3b4   : > { %v274_v45 = vld [vmem:[#allocation3] sm:$0xff] }
 0x3b5   : > { %478 = vlog2.f32 %v274_v45 }
 0x3b8   : > { %v281_v46 = vld [vmem:[#allocation4] sm:$0xff] }
 0x3b9   : > { %v282_v48 = vmul.f32 0.005, %v281_v46 }
 0x3bb   : > { %v283_v54 = vmul.f32 0.1, %v282_v48 }
 0x3bf   : > { %v479_v49 = vpop.eup %478 }
 0x3c0   : > { %v276_v50 = vmul.f32 0.6931472, %v479_v49 }
 0x3c2   : > { %v277_v53 = vadd.f32 %v276_v50, %v273_v52 }
 0x3c4   : > { %v280_v55 = vsub.f32 %v277_v53, %v279_v51 }
 0x3c6   : > { %v284_v56 = vsub.f32 %v280_v55, %v283_v54 }
 0x3c8   : > { %285 = vst.msk [vmem:[%s729_s24] sm:$0xff] %vm265_vm3, %v284_v56 }
 0x3c9 PF: > { %s15_s16 = sadd.s32 1, %s576_s16   ;;  %s778_s9 = smov %s552_s10 }
 0x3ca   : > { %p12_p8 = scmp.ge.s32.totalorder %s15_s16, 6   ;;  %s779_s10 = smov %s556_s11 }
 0x3cb   : > { %s780_s11 = smov %s665_s29  ;;  %s781_s12 = smov %s568_s14 }
 0x3cc   : > { %s782_s13 = smov %s572_s15  ;;  %s783_s14 = smov %s786_s18 }
 0x3cd   : > { %s784_s15 = smov %s790_s19  ;;  %14 = sbr.rel (!%p12_p8) target bundleno = 5 (0x5), region = 83 }
 0x3d4   :  { %305 = vsyncpa [#allocation6], 1 }
 0x3d5   :  { %307 = vsyncpa [#allocation6 + $0x1], 1 }

</bundles_post_ra>
